<compile_context>
chip_gen: v6e
topology: v6e:2x2x1
jax: 0.10.0
libtpu: 0.0.40
codegen_flags: <defaults>
</compile_context>

<pallas_src>
import jax
import jax.numpy as jnp
from jax.experimental import pallas as pl
from jax.experimental.pallas import tpu as pltpu

EMBED_SIZE = 64
FEAT_SIZE = 32
NEG_SLOPE = 1.0          # nn.LeakyReLU(True): negative_slope = True == 1.0 (identity)
FUSED_ROW_LIMIT = 1024   # above this many total rows, use the row-tiled parallel path
TILE_M = 4096            # row tile for the tiled fallback path (well under VMEM limits)


def _maybe_leaky(y):
    # negative_slope == 1.0 -> identity; skip the compare/select entirely.
    if NEG_SLOPE != 1.0:
        y = jnp.where(y >= 0, y, NEG_SLOPE * y)
    return y


# ----------------------------------------------------------------------------
# Fused small-batch path: one launch for user + every item-dict entry.
# ----------------------------------------------------------------------------
def _make_fused_kernel(nk):
    def kernel(xu_ref, *args):
        item_refs = args[:nk]
        wu_ref, bu_ref, wi_ref, bi_ref, ou_ref, oi_ref = args[nk:]

        yu = jnp.dot(xu_ref[...], wu_ref[...], preferred_element_type=jnp.float32)
        ou_ref[...] = _maybe_leaky(yu + bu_ref[...]).astype(ou_ref.dtype)

        for j in range(nk):  # static unroll over dict entries
            yj = jnp.dot(item_refs[j][...], wi_ref[...],
                         preferred_element_type=jnp.float32)
            oi_ref[j] = _maybe_leaky(yj + bi_ref[...]).astype(oi_ref.dtype)

    return kernel


def _fused_forward(user2d, item_list, wu, bu, wi, bi):
    """Single pallas_call: user @ Wu and every item entry @ Wi, real-width out."""
    Mu, K = user2d.shape
    nk = len(item_list)
    bsz = item_list[0].shape[0]
    N = wu.shape[1]

    flops = 2 * (Mu + nk * bsz) * K * N
    bytes_accessed = 4 * ((Mu + nk * bsz) * (K + N) + 2 * (K * N + N))

    ou, oi = pl.pallas_call(
        _make_fused_kernel(nk),
        out_shape=(jax.ShapeDtypeStruct((Mu, N), jnp.float32),
                   jax.ShapeDtypeStruct((nk, bsz, N), jnp.float32)),
        grid=(1,),
        in_specs=[pl.BlockSpec((Mu, K), lambda i: (0, 0))]
                 + [pl.BlockSpec((bsz, K), lambda i: (0, 0)) for _ in range(nk)]
                 + [pl.BlockSpec((K, N), lambda i: (0, 0)),
                    pl.BlockSpec((1, N), lambda i: (0, 0)),
                    pl.BlockSpec((K, N), lambda i: (0, 0)),
                    pl.BlockSpec((1, N), lambda i: (0, 0))],
        out_specs=(pl.BlockSpec((Mu, N), lambda i: (0, 0)),
                   pl.BlockSpec((nk, bsz, N), lambda i: (0, 0, 0))),
        compiler_params=pltpu.CompilerParams(
            dimension_semantics=("arbitrary",)),
        cost_estimate=pl.CostEstimate(
            flops=flops, transcendentals=0, bytes_accessed=bytes_accessed),
    )(user2d, *item_list, wu, bu, wi, bi)
    return ou, oi


# ----------------------------------------------------------------------------
# Large-M fallback: row-tiled linear, parallel grid, real-width output.
# ----------------------------------------------------------------------------
def _tiled_linear_kernel(x_ref, w_ref, b_ref, o_ref):
    y = jnp.dot(x_ref[...], w_ref[...], preferred_element_type=jnp.float32)
    o_ref[...] = _maybe_leaky(y + b_ref[...]).astype(o_ref.dtype)


def _tiled_linear(x2d, w, b, *, tm=TILE_M):
    M, K = x2d.shape
    N = w.shape[1]
    # If the whole array fits in one tile, use the full extent (single block,
    # always layout-legal); otherwise tm=4096 (divisible by 8, ragged last
    # block is masked by Pallas — no pre-pad of x).
    tm_eff = M if M <= tm else tm
    grid_m = pl.cdiv(M, tm_eff)
    # NOTE: constant-index W/b blocks (lambda i: (0, 0)) are revisited blocks;
    # Mosaic elides the repeated DMA, so no manual VMEM caching is needed.
    return pl.pallas_call(
        _tiled_linear_kernel,
        out_shape=jax.ShapeDtypeStruct((M, N), jnp.float32),
        grid=(grid_m,),
        in_specs=[pl.BlockSpec((tm_eff, K), lambda i: (i, 0)),
                  pl.BlockSpec((K, N), lambda i: (0, 0)),
                  pl.BlockSpec((1, N), lambda i: (0, 0))],
        out_specs=pl.BlockSpec((tm_eff, N), lambda i: (i, 0)),
        compiler_params=pltpu.CompilerParams(
            dimension_semantics=("parallel",)),
        cost_estimate=pl.CostEstimate(
            flops=2 * M * K * N, transcendentals=0,
            bytes_accessed=4 * (M * K + K * N + N + M * N)),
    )(x2d, w, b)


# ----------------------------------------------------------------------------
# Whole forward pass under one jit (dispatch + casts + kernel + reshapes).
# ----------------------------------------------------------------------------
@jax.jit
def _decoder_forward(user, item_vals, user_w, user_b, item_w, item_b):
    user2d = user.astype(jnp.float32)
    item_list = [v.astype(jnp.float32) for v in item_vals]
    nk = len(item_list)
    bsz = item_list[0].shape[0]
    Mu = user2d.shape[0]
    Mi = nk * bsz

    if Mu + Mi <= FUSED_ROW_LIMIT:
        return _fused_forward(user2d, item_list, user_w, user_b, item_w, item_b)

    # Large-row path: row-tiled, parallel grid (uses both TCs on v7x).
    # User rows are typically tiny -> single full-block launch via tm_eff=M.
    ou = _tiled_linear(user2d, user_w, user_b)
    item2d = jnp.concatenate(item_list, axis=0)
    oi = _tiled_linear(item2d, item_w, item_b).reshape(nk, bsz, item_w.shape[1])
    return ou, oi


# ----------------------------------------------------------------------------
# Parameter init + module wrapper.
# ----------------------------------------------------------------------------
def init_linear_params(key, in_features, out_features):
    """Mimics torch.nn.Linear init (uniform +-1/sqrt(fan_in)).

    Returns W of shape (in_features, out_features) (transposed vs torch) and
    b of shape (1, out_features).
    """
    kw, kb = jax.random.split(key)
    bound = 1.0 / jnp.sqrt(jnp.float32(in_features))
    w = jax.random.uniform(kw, (in_features, out_features), jnp.float32,
                           minval=-bound, maxval=bound)
    b = jax.random.uniform(kb, (1, out_features), jnp.float32,
                           minval=-bound, maxval=bound)
    return w, b


class DecoderPallas:
    def __init__(self, feat_size, embed_size=64, key=jax.random.PRNGKey(0)):
        self.feat_size = int(feat_size)
        self.embed_size = int(embed_size)
        ku, ki = jax.random.split(key)
        self.user_w, self.user_b = init_linear_params(ku, embed_size, self.feat_size)
        self.item_w, self.item_b = init_linear_params(ki, embed_size, self.feat_size)

    def __call__(self, user, item):
        # Preserve dict *insertion* order (matches torch's `for key in item.keys()`);
        # converting to a tuple here keeps the order stable under jit.
        item_vals = tuple(item[k] for k in item.keys())
        return _decoder_forward(user, item_vals,
                                self.user_w, self.user_b,
                                self.item_w, self.item_b)


if __name__ == "__main__":
    key = jax.random.PRNGKey(0)
    k_params, k_user, k_i0, k_i1, k_i2 = jax.random.split(key, 5)

    batch = 8
    decoder = DecoderPallas(feat_size=FEAT_SIZE, embed_size=EMBED_SIZE, key=k_params)

    user = jax.random.normal(k_user, (batch, EMBED_SIZE), jnp.float32)
    item = {
        "genre": jax.random.normal(k_i0, (batch, EMBED_SIZE), jnp.float32),
        "director": jax.random.normal(k_i1, (batch, EMBED_SIZE), jnp.float32),
        "actor": jax.random.normal(k_i2, (batch, EMBED_SIZE), jnp.float32),
    }

    user_out, item_out = decoder(user, item)
    jax.block_until_ready((user_out, item_out))

    # Pure-JAX reference (LeakyReLU(True) -> slope 1.0 -> identity).
    def ref_lrelu(y):
        return jnp.where(y >= 0, y, NEG_SLOPE * y)

    ref_user = ref_lrelu(user @ decoder.user_w + decoder.user_b)
    item_stacked = jnp.stack([item[k] for k in item.keys()])
    ref_item = ref_lrelu(item_stacked @ decoder.item_w + decoder.item_b)

    assert user_out.shape == (batch, FEAT_SIZE)
    assert item_out.shape == (3, batch, FEAT_SIZE)
    assert jnp.allclose(user_out, ref_user, atol=1e-5, rtol=1e-5)
    assert jnp.allclose(item_out, ref_item, atol=1e-5, rtol=1e-5)

    print("KERNEL_OK")
</pallas_src>

<mosaic_0001>
module attributes {stable_mosaic.version = 11 : i64} {
  func.func @kernel(%arg0: i32, %arg1: memref<8x64xf32, #tpu.memory_space<vmem>>, %arg2: memref<8x64xf32, #tpu.memory_space<vmem>>, %arg3: memref<8x64xf32, #tpu.memory_space<vmem>>, %arg4: memref<8x64xf32, #tpu.memory_space<vmem>>, %arg5: memref<64x32xf32, #tpu.memory_space<vmem>>, %arg6: memref<1x32xf32, #tpu.memory_space<vmem>>, %arg7: memref<64x32xf32, #tpu.memory_space<vmem>>, %arg8: memref<1x32xf32, #tpu.memory_space<vmem>>, %arg9: memref<8x32xf32, #tpu.memory_space<vmem>>, %arg10: memref<3x8x32xf32, #tpu.memory_space<vmem>>) attributes {dimension_semantics = [#tpu.dimension_semantics<arbitrary>], iteration_bounds = array<i64: 1>, scalar_prefetch = 0 : i64, scratch_operands = 0 : i64, tpu.core_type = #tpu.core_type<tc>, window_params = [{pipeline_mode = #tpu.pipeline_mode<synchronous>, transform_indices = @transform_0, window_bounds = array<i64: 8, 64>}, {pipeline_mode = #tpu.pipeline_mode<synchronous>, transform_indices = @transform_1, window_bounds = array<i64: 8, 64>}, {pipeline_mode = #tpu.pipeline_mode<synchronous>, transform_indices = @transform_2, window_bounds = array<i64: 8, 64>}, {pipeline_mode = #tpu.pipeline_mode<synchronous>, transform_indices = @transform_3, window_bounds = array<i64: 8, 64>}, {pipeline_mode = #tpu.pipeline_mode<synchronous>, transform_indices = @transform_4, window_bounds = array<i64: 64, 32>}, {pipeline_mode = #tpu.pipeline_mode<synchronous>, transform_indices = @transform_5, window_bounds = array<i64: 1, 32>}, {pipeline_mode = #tpu.pipeline_mode<synchronous>, transform_indices = @transform_6, window_bounds = array<i64: 64, 32>}, {pipeline_mode = #tpu.pipeline_mode<synchronous>, transform_indices = @transform_7, window_bounds = array<i64: 1, 32>}, {pipeline_mode = #tpu.pipeline_mode<synchronous>, transform_indices = @transform_8, window_bounds = array<i64: 8, 32>}, {pipeline_mode = #tpu.pipeline_mode<synchronous>, transform_indices = @transform_9, window_bounds = array<i64: 3, 8, 32>}]} {
    %c0 = arith.constant 0 : index
    %c0_0 = arith.constant 0 : index
    %0 = vector.load %arg1[%c0, %c0_0] : memref<8x64xf32, #tpu.memory_space<vmem>>, vector<8x64xf32>
    %c0_1 = arith.constant 0 : index
    %c0_2 = arith.constant 0 : index
    %1 = vector.load %arg5[%c0_1, %c0_2] : memref<64x32xf32, #tpu.memory_space<vmem>>, vector<64x32xf32>
    %cst = arith.constant dense<0.000000e+00> : vector<8x32xf32>
    %2 = tpu.matmul %0, %1, %cst {dimension_numbers = #tpu.dot_dimension_numbers<[1], [0], [0], [1], [0, 0, 1, 1], [], []>} : vector<8x64xf32>, vector<64x32xf32>, vector<8x32xf32> -> vector<8x32xf32>
    %c0_3 = arith.constant 0 : index
    %c0_4 = arith.constant 0 : index
    %3 = vector.load %arg6[%c0_3, %c0_4] : memref<1x32xf32, #tpu.memory_space<vmem>>, vector<1x32xf32>
    %4 = vector.broadcast %3 : vector<1x32xf32> to vector<8x32xf32>
    %5 = arith.addf %2, %4 : vector<8x32xf32>
    %c0_5 = arith.constant 0 : index
    %c0_6 = arith.constant 0 : index
    %6 = vector.load %arg9[%c0_5, %c0_6] : memref<8x32xf32, #tpu.memory_space<vmem>>, vector<8x32xf32>
    tpu.vector_store %arg9[%c0_5, %c0_6], %5 {strides = array<i32>} : memref<8x32xf32, #tpu.memory_space<vmem>>, vector<8x32xf32>,
    %c0_7 = arith.constant 0 : index
    %c0_8 = arith.constant 0 : index
    %7 = vector.load %arg2[%c0_7, %c0_8] : memref<8x64xf32, #tpu.memory_space<vmem>>, vector<8x64xf32>
    %c0_9 = arith.constant 0 : index
    %c0_10 = arith.constant 0 : index
    %8 = vector.load %arg7[%c0_9, %c0_10] : memref<64x32xf32, #tpu.memory_space<vmem>>, vector<64x32xf32>
    %cst_11 = arith.constant dense<0.000000e+00> : vector<8x32xf32>
    %9 = tpu.matmul %7, %8, %cst_11 {dimension_numbers = #tpu.dot_dimension_numbers<[1], [0], [0], [1], [0, 0, 1, 1], [], []>} : vector<8x64xf32>, vector<64x32xf32>, vector<8x32xf32> -> vector<8x32xf32>
    %c0_12 = arith.constant 0 : index
    %c0_13 = arith.constant 0 : index
    %10 = vector.load %arg8[%c0_12, %c0_13] : memref<1x32xf32, #tpu.memory_space<vmem>>, vector<1x32xf32>
    %11 = vector.broadcast %10 : vector<1x32xf32> to vector<8x32xf32>
    %12 = arith.addf %9, %11 : vector<8x32xf32>
    %c0_14 = arith.constant 0 : index
    %c0_15 = arith.constant 0 : index
    %c0_16 = arith.constant 0 : index
    %13 = vector.load %arg10[%c0_14, %c0_15, %c0_16] : memref<3x8x32xf32, #tpu.memory_space<vmem>>, vector<1x8x32xf32>
    %14 = vector.shape_cast %13 : vector<1x8x32xf32> to vector<8x32xf32>
    %15 = vector.shape_cast %12 : vector<8x32xf32> to vector<1x8x32xf32>
    tpu.vector_store %arg10[%c0_14, %c0_15, %c0_16], %15 {strides = array<i32>} : memref<3x8x32xf32, #tpu.memory_space<vmem>>, vector<1x8x32xf32>,
    %c0_17 = arith.constant 0 : index
    %c0_18 = arith.constant 0 : index
    %16 = vector.load %arg3[%c0_17, %c0_18] : memref<8x64xf32, #tpu.memory_space<vmem>>, vector<8x64xf32>
    %c0_19 = arith.constant 0 : index
    %c0_20 = arith.constant 0 : index
    %17 = vector.load %arg7[%c0_19, %c0_20] : memref<64x32xf32, #tpu.memory_space<vmem>>, vector<64x32xf32>
    %cst_21 = arith.constant dense<0.000000e+00> : vector<8x32xf32>
    %18 = tpu.matmul %16, %17, %cst_21 {dimension_numbers = #tpu.dot_dimension_numbers<[1], [0], [0], [1], [0, 0, 1, 1], [], []>} : vector<8x64xf32>, vector<64x32xf32>, vector<8x32xf32> -> vector<8x32xf32>
    %c0_22 = arith.constant 0 : index
    %c0_23 = arith.constant 0 : index
    %19 = vector.load %arg8[%c0_22, %c0_23] : memref<1x32xf32, #tpu.memory_space<vmem>>, vector<1x32xf32>
    %20 = vector.broadcast %19 : vector<1x32xf32> to vector<8x32xf32>
    %21 = arith.addf %18, %20 : vector<8x32xf32>
    %c1 = arith.constant 1 : index
    %c0_24 = arith.constant 0 : index
    %c0_25 = arith.constant 0 : index
    %22 = vector.load %arg10[%c1, %c0_24, %c0_25] : memref<3x8x32xf32, #tpu.memory_space<vmem>>, vector<1x8x32xf32>
    %23 = vector.shape_cast %22 : vector<1x8x32xf32> to vector<8x32xf32>
    %24 = vector.shape_cast %21 : vector<8x32xf32> to vector<1x8x32xf32>
    tpu.vector_store %arg10[%c1, %c0_24, %c0_25], %24 {strides = array<i32>} : memref<3x8x32xf32, #tpu.memory_space<vmem>>, vector<1x8x32xf32>,
    %c0_26 = arith.constant 0 : index
    %c0_27 = arith.constant 0 : index
    %25 = vector.load %arg4[%c0_26, %c0_27] : memref<8x64xf32, #tpu.memory_space<vmem>>, vector<8x64xf32>
    %c0_28 = arith.constant 0 : index
    %c0_29 = arith.constant 0 : index
    %26 = vector.load %arg7[%c0_28, %c0_29] : memref<64x32xf32, #tpu.memory_space<vmem>>, vector<64x32xf32>
    %cst_30 = arith.constant dense<0.000000e+00> : vector<8x32xf32>
    %27 = tpu.matmul %25, %26, %cst_30 {dimension_numbers = #tpu.dot_dimension_numbers<[1], [0], [0], [1], [0, 0, 1, 1], [], []>} : vector<8x64xf32>, vector<64x32xf32>, vector<8x32xf32> -> vector<8x32xf32>
    %c0_31 = arith.constant 0 : index
    %c0_32 = arith.constant 0 : index
    %28 = vector.load %arg8[%c0_31, %c0_32] : memref<1x32xf32, #tpu.memory_space<vmem>>, vector<1x32xf32>
    %29 = vector.broadcast %28 : vector<1x32xf32> to vector<8x32xf32>
    %30 = arith.addf %27, %29 : vector<8x32xf32>
    %c2 = arith.constant 2 : index
    %c0_33 = arith.constant 0 : index
    %c0_34 = arith.constant 0 : index
    %31 = vector.load %arg10[%c2, %c0_33, %c0_34] : memref<3x8x32xf32, #tpu.memory_space<vmem>>, vector<1x8x32xf32>
    %32 = vector.shape_cast %31 : vector<1x8x32xf32> to vector<8x32xf32>
    %33 = vector.shape_cast %30 : vector<8x32xf32> to vector<1x8x32xf32>
    tpu.vector_store %arg10[%c2, %c0_33, %c0_34], %33 {strides = array<i32>} : memref<3x8x32xf32, #tpu.memory_space<vmem>>, vector<1x8x32xf32>,
    return
  }
  func.func @transform_0(%arg0: i32) -> (i32, i32) {
    %c0_i32 = arith.constant 0 : i32
    %c0_i32_0 = arith.constant 0 : i32
    %c0_i32_1 = arith.constant 0 : i32
    return %c0_i32, %c0_i32_0 : i32, i32
  }
  func.func @transform_1(%arg0: i32) -> (i32, i32) {
    %c0_i32 = arith.constant 0 : i32
    %c0_i32_0 = arith.constant 0 : i32
    %c0_i32_1 = arith.constant 0 : i32
    return %c0_i32, %c0_i32_0 : i32, i32
  }
  func.func @transform_2(%arg0: i32) -> (i32, i32) {
    %c0_i32 = arith.constant 0 : i32
    %c0_i32_0 = arith.constant 0 : i32
    %c0_i32_1 = arith.constant 0 : i32
    return %c0_i32, %c0_i32_0 : i32, i32
  }
  func.func @transform_3(%arg0: i32) -> (i32, i32) {
    %c0_i32 = arith.constant 0 : i32
    %c0_i32_0 = arith.constant 0 : i32
    %c0_i32_1 = arith.constant 0 : i32
    return %c0_i32, %c0_i32_0 : i32, i32
  }
  func.func @transform_4(%arg0: i32) -> (i32, i32) {
    %c0_i32 = arith.constant 0 : i32
    %c0_i32_0 = arith.constant 0 : i32
    %c0_i32_1 = arith.constant 0 : i32
    return %c0_i32, %c0_i32_0 : i32, i32
  }
  func.func @transform_5(%arg0: i32) -> (i32, i32) {
    %c0_i32 = arith.constant 0 : i32
    %c0_i32_0 = arith.constant 0 : i32
    %c0_i32_1 = arith.constant 0 : i32
    return %c0_i32, %c0_i32_0 : i32, i32
  }
  func.func @transform_6(%arg0: i32) -> (i32, i32) {
    %c0_i32 = arith.constant 0 : i32
    %c0_i32_0 = arith.constant 0 : i32
    %c0_i32_1 = arith.constant 0 : i32
    return %c0_i32, %c0_i32_0 : i32, i32
  }
  func.func @transform_7(%arg0: i32) -> (i32, i32) {
    %c0_i32 = arith.constant 0 : i32
    %c0_i32_0 = arith.constant 0 : i32
    %c0_i32_1 = arith.constant 0 : i32
    return %c0_i32, %c0_i32_0 : i32, i32
  }
  func.func @transform_8(%arg0: i32) -> (i32, i32) {
    %c0_i32 = arith.constant 0 : i32
    %c0_i32_0 = arith.constant 0 : i32
    %c0_i32_1 = arith.constant 0 : i32
    return %c0_i32, %c0_i32_0 : i32, i32
  }
  func.func @transform_9(%arg0: i32) -> (i32, i32, i32) {
    %c0_i32 = arith.constant 0 : i32
    %c0_i32_0 = arith.constant 0 : i32
    %c0_i32_1 = arith.constant 0 : i32
    %c0_i32_2 = arith.constant 0 : i32
    return %c0_i32, %c0_i32_0, %c0_i32_1 : i32, i32, i32
  }
}

</mosaic_0001>

<bundles_post_ra>
// kernel: _decoder_forward.1
= control target key start
LH: loop header
LB: loop body
LE: loop exit
PB: predicated region body
PF: predicated region fallthrough
CT: control target
= control target key end

     0   :  { %15 = vsyncpa [#allocation3], 0  ;;  %v597_v2 = vmov 0.0   ;;  %s773_s0 = inlined_call_operand.vmem [shape: f32[8,64], index: 0, kind: input, shape index: {}]   ;;  %s774_s1 = inlined_call_operand.vmem [shape: f32[8,64], index: 1, kind: input, shape index: {}]   ;;  %s775_s2 = inlined_call_operand.vmem [shape: f32[8,64], index: 2, kind: input, shape index: {}]   ;;  %s776_s3 = inlined_call_operand.vmem [shape: f32[8,64], index: 3, kind: input, shape index: {}]   ;;  %s777_s4 = inlined_call_operand.vmem [shape: f32[64,32], index: 4, kind: input, shape index: {}]   ;;  %s778_s5 = inlined_call_operand.vmem [shape: f32[1,32], index: 5, kind: input, shape index: {}]   ;;  %s779_s6 = inlined_call_operand.vmem [shape: f32[64,32], index: 6, kind: input, shape index: {}]   ;;  %s780_s7 = inlined_call_operand.vmem [shape: f32[1,32], index: 7, kind: input, shape index: {}]   ;;  %s781_s8 = inlined_call_operand.hbm [shape: f32[8,32], index: 8, kind: output, shape index: {0}]   ;;  %s782_s9 = inlined_call_operand.hbm [shape: f32[3,8,32], index: 9, kind: output, shape index: {1}]  }
   0x1   :  { %v41_v0 = vld [vmem:[%s777_s4 + $0x38] sm:$0xff]  ;;  %471 = vmatprep.subr.mxu0 %v597_v2  ;;  %490 = vmatprep.subr.mxu1 %v597_v2  ;;  %v40_v3 = vld [vmem:[%s777_s4 + $0x30] sm:$0xff]  ;;  %v39_v5 = vld [vmem:[%s777_s4 + $0x28] sm:$0xff] }
   0x2   :  { %v133_v1 = vld [vmem:[%s779_s6 + $0x38] sm:$0xff]  ;;  %v132_v4 = vld [vmem:[%s779_s6 + $0x30] sm:$0xff]  ;;  %472 = vmatpush3.msra.mxu0 %v41_v0  ;;  %v131_v6 = vld [vmem:[%s779_s6 + $0x28] sm:$0xff] }
   0x3   :  { %491 = vmatpush3.msra.mxu1 %v133_v1  ;;  %473 = vmatprep.subr.mxu0 %v597_v2  ;;  %v38_v7 = vld [vmem:[%s777_s4 + $0x20] sm:$0xff]  ;;  %v37_v9 = vld [vmem:[%s777_s4 + $0x18] sm:$0xff] }
   0x4   :  { %492 = vmatprep.subr.mxu1 %v597_v2  ;;  %474 = vmatpush3.msra.mxu0 %v40_v3  ;;  %v130_v8 = vld [vmem:[%s779_s6 + $0x20] sm:$0xff]  ;;  %v129_v10 = vld [vmem:[%s779_s6 + $0x18] sm:$0xff] }
   0x5   :  { %493 = vmatpush3.msra.mxu1 %v132_v4  ;;  %475 = vmatprep.subr.mxu0 %v597_v2 }
   0x6   :  { %494 = vmatprep.subr.mxu1 %v597_v2  ;;  %476 = vmatpush3.msra.mxu0 %v39_v5 }
   0x7   :  { %495 = vmatpush3.msra.mxu1 %v131_v6  ;;  %477 = vmatprep.subr.mxu0 %v597_v2 }
   0x8   :  { %496 = vmatprep.subr.mxu1 %v597_v2 }
   0x9   :  { %16 = vsyncpa [#allocation5], 0  ;;  %478 = vmatpush3.msra.mxu0 %v38_v7  ;;  %497 = vmatpush3.msra.mxu1 %v130_v8  ;;  %v36_v11 = vld [vmem:[%s777_s4 + $0x10] sm:$0xff]  ;;  %v35_v13 = vld [vmem:[%s777_s4 + $0x8] sm:$0xff]  ;;  %vm49_vm0 = vcmask 523264   ;;  %vm598_vm1 = vmmov 0  }
   0xa   :  { %479 = vmatprep.subr.mxu0 %v597_v2  ;;  %498 = vmatprep.subr.mxu1 %v597_v2  ;;  %v128_v12 = vld [vmem:[%s779_s6 + $0x10] sm:$0xff]  ;;  %v127_v14 = vld [vmem:[%s779_s6 + $0x8] sm:$0xff]  ;;  %v34_v15 = vld [vmem:[%s777_s4] sm:$0xff]  ;;  %vm123_vm2 = vcmask 261120  }
   0xb   :  { %480 = vmatpush3.msra.mxu0 %v37_v9  ;;  %499 = vmatpush3.msra.mxu1 %v129_v10  ;;  %v126_v16 = vld [vmem:[%s779_s6] sm:$0xff] }
   0xc   :  { %481 = vmatprep.subr.mxu0 %v597_v2  ;;  %500 = vmatprep.subr.mxu1 %v597_v2  ;;  %v33_v17 = vld [vmem:[%s773_s0] sm:$0xff] }
   0xd   :  { %482 = vmatpush3.msra.mxu0 %v36_v11  ;;  %501 = vmatpush3.msra.mxu1 %v128_v12  ;;  %v125_v18 = vld [vmem:[%s774_s1] sm:$0xff] }
   0xe   :  { %483 = vmatprep.subr.mxu0 %v597_v2  ;;  %502 = vmatprep.subr.mxu1 %v597_v2  ;;  %v215_v19 = vld [vmem:[%s775_s2] sm:$0xff] }
   0xf   :  { %484 = vmatpush3.msra.mxu0 %v35_v13  ;;  %503 = vmatpush3.msra.mxu1 %v127_v14  ;;  %v306_v20 = vld [vmem:[%s776_s3] sm:$0xff]  ;;  %s599_s3 = smov [#allocation2]  }
  0x10   :  { %485 = vmatprep.subr.mxu0 %v597_v2  ;;  %504 = vmatprep.subr.mxu1 %v597_v2  ;;  %v427_v21 = vld [vmem:[%s778_s5] ss:$0 sm:$0xff]  ;;  %s403_s27 = sshll.u32 %s599_s3, 4  ;;  %s404_s27 = int_to_ptr.vmem [resolvable:$true] %s403_s27 }
  0x11   :  { %486 = vmatpush3.msra.mxu0 %v34_v15  ;;  %487 = vmatprep.mubr.msk.f32.mxu0 %vm598_vm1, %v597_v2  ;;  %v429_v22 = vld [vmem:[%s780_s7] ss:$0 sm:$0xff]  ;;  %s553_s28 = scalar_lea.vmem %s404_s27, 128  ;;  %p558_p1 = scmp.lt.s32.totalorder %s404_s27, %s404_s27 }
  0x12   :  { %505 = vmatpush3.msra.mxu1 %v126_v16  ;;  %506 = vmatprep.mubr.msk.f32.mxu1 %vm598_vm1, %v597_v2  ;;  %p554_p0 = scmp.ne.s32.totalorder %s404_s27, %s553_s28  ;;  %p559_p2 = scmp.lt.s32.totalorder %s553_s28, %s553_s28 }
  0x13   :  { %488 = vmatmul.mubr.msk.f32.vlgmr.msra.gmra.mxu0 %vm49_vm0, %v33_v17  ;;  %507 = vmatmul.mubr.msk.f32.vlgmr.msra.gmra.mxu1 %vm49_vm0, %v125_v18 }
  0x14   :  { %509 = vmatprep.subr.mxu0 %v597_v2  ;;  %528 = vmatprep.subr.mxu1 %v597_v2  ;;  %p560_p3 = por %p559_p2, %p558_p1 }
  0x15   :  { %510 = vmatpush3.msra.mxu0 %v133_v1  ;;  %529 = vmatpush3.msra.mxu1 %v133_v1 }
  0x16   :  { %511 = vmatprep.subr.mxu0 %v597_v2  ;;  %530 = vmatprep.subr.mxu1 %v597_v2  ;;  %p561_p4 = pnand %p560_p3, %p554_p0 }
  0x17   :  { %512 = vmatpush3.msra.mxu0 %v132_v4  ;;  %531 = vmatpush3.msra.mxu1 %v132_v4 }
  0x18   :  { %513 = vmatprep.subr.mxu0 %v597_v2  ;;  %532 = vmatprep.subr.mxu1 %v597_v2 }
  0x19   :  { %514 = vmatpush3.msra.mxu0 %v131_v6  ;;  %533 = vmatpush3.msra.mxu1 %v131_v6 }
  0x1a   :  { %515 = vmatprep.subr.mxu0 %v597_v2  ;;  %534 = vmatprep.subr.mxu1 %v597_v2 }
  0x1b   :  { %516 = vmatpush3.msra.mxu0 %v130_v8  ;;  %535 = vmatpush3.msra.mxu1 %v130_v8 }
  0x1c   :  { %517 = vmatprep.subr.mxu0 %v597_v2  ;;  %536 = vmatprep.subr.mxu1 %v597_v2 }
  0x1d   :  { %518 = vmatpush3.msra.mxu0 %v129_v10  ;;  %537 = vmatpush3.msra.mxu1 %v129_v10 }
  0x1e   :  { %519 = vmatprep.subr.mxu0 %v597_v2  ;;  %538 = vmatprep.subr.mxu1 %v597_v2 }
  0x1f   :  { %520 = vmatpush3.msra.mxu0 %v128_v12  ;;  %539 = vmatpush3.msra.mxu1 %v128_v12 }
  0x20   :  { %521 = vmatprep.subr.mxu0 %v597_v2  ;;  %540 = vmatprep.subr.mxu1 %v597_v2 }
  0x21   :  { %522 = vmatpush3.msra.mxu0 %v127_v14  ;;  %541 = vmatpush3.msra.mxu1 %v127_v14 }
  0x22   :  { %523 = vmatprep.subr.mxu0 %v597_v2  ;;  %542 = vmatprep.subr.mxu1 %v597_v2 }
  0x23   :  { %524 = vmatpush3.msra.mxu0 %v126_v16  ;;  %525 = vmatprep.mubr.msk.f32.mxu0 %vm598_vm1, %v597_v2 }
  0x24   :  { %543 = vmatpush3.msra.mxu1 %v126_v16  ;;  %544 = vmatprep.mubr.msk.f32.mxu1 %vm598_vm1, %v597_v2 }
  0x25   :  { %526 = vmatmul.mubr.msk.f32.vlgmr.msra.gmra.mxu0 %vm49_vm0, %v215_v19  ;;  %545 = vmatmul.mubr.msk.f32.vlgmr.msra.gmra.mxu1 %vm49_vm0, %v306_v20 }
  0xd3   :  { %v119_v23 = vpop.f32.mrf.mxu0  ;;  %v210_v24 = vpop.f32.mrf.mxu1 }
  0xd4   :  { %v120_v25 = vadd.f32 %v427_v21, %v119_v23  ;;  %v211_v26 = vadd.f32 %v429_v22, %v210_v24 }
  0xd5   :  { %v489_v27 = vpop.f32.mrf.mxu0  ;;  %v508_v28 = vpop.f32.mrf.mxu1 }
  0xd6   :  { %214 = vst.msk [vmem:[#allocation4] sm:$0xff] %vm123_vm2, %v211_v26  ;;  %124 = vst.msk [vmem:[#allocation2] sm:$0xff] %vm123_vm2, %v120_v25 }
  0xd7   :  { %564 = shalt.err (!%p561_p4)
}
  0xd8   :  { %406 = dma.vmem_to_hbm [thread:$0]  %s404_s27, 128, %s781_s8, [#allocation3]  }
  0xd9   :  { %s600_s29 = smov [#allocation4]  }
  0xda   :  { %s412_s30 = sshll.u32 %s600_s29, 4  ;;  %s413_s30 = int_to_ptr.vmem [resolvable:$true] %s412_s30 }
  0xdb   :  { %s573_s10 = scalar_lea.vmem %s413_s30, 384  ;;  %p578_p6 = scmp.lt.s32.totalorder %s413_s30, %s413_s30 }
  0xdc   :  { %p574_p5 = scmp.ne.s32.totalorder %s413_s30, %s573_s10  ;;  %p579_p7 = scmp.lt.s32.totalorder %s573_s10, %s573_s10 }
  0xde   :  { %p580_p8 = por %p579_p7, %p578_p6 }
  0xe0   :  { %p581_p9 = pnand %p580_p8, %p574_p5 }
  0xe5   :  { %v300_v29 = vpop.f32.mrf.mxu0  ;;  %v391_v30 = vpop.f32.mrf.mxu1 }
  0xe6   :  { %v301_v31 = vadd.f32 %v429_v22, %v300_v29  ;;  %v392_v32 = vadd.f32 %v429_v22, %v391_v30 }
  0xe7   :  { %v527_v33 = vpop.f32.mrf.mxu0  ;;  %v546_v34 = vpop.f32.mrf.mxu1 }
  0xe8   :  { %305 = vst.msk [vmem:[#allocation4 + $0x8] sm:$0xff] %vm123_vm2, %v301_v31  ;;  %396 = vst.msk [vmem:[#allocation4 + $0x10] sm:$0xff] %vm123_vm2, %v392_v32 }
  0xe9   :  { %584 = shalt.err (!%p581_p9)
}
  0xea   :  { %s601_s8 = smov 128   ;;  %s602_s11 = smov 8  }
  0xeb   :  { %418 = dma.vmem_to_hbm [thread:$0]  %s413_s30, 384, %s782_s9, [#allocation5], %s601_s8, %s601_s8, %s602_s11  }
  0xec   :  { %593 = dma.done.wait [#allocation3], 128  }
  0xed   :  { %594 = vsyncadd [#allocation3], 4294967168 }
  0xee   :  { %595 = dma.done.wait [#allocation5], 384  }
  0xef   :  { %596 = vsyncadd [#allocation5], 4294966912 }
  0xf0   :  { %425 = vsyncpa [#allocation3], 1 }
  0xf1   :  { %426 = vsyncpa [#allocation5], 1 }

</bundles_post_ra>
